<compile_context>
chip_gen: v7x
topology: tpu7x:2x2x1
jax: 0.10.0
libtpu: 0.0.40
codegen_flags: <defaults>
</compile_context>

<pallas_src>
import jax
import jax.numpy as jnp
import numpy as np
from jax.experimental import pallas as pl
from jax.experimental.pallas import tpu as pltpu

VOCAB = 23
EMB_DIM = 32   # config.emb_dim


def _round_up(x, m):
    return int(pl.cdiv(x, m)) * m


def data_encoder_kernel(idx_ref, emb_t_ref, out_ref, counts_ref):
    """idx_ref:    [s_blk, TB] int32   (seq on sublanes, batch on lanes)
       emb_t_ref:  [Dp, Vp]    f32     (transposed, zero-padded table)
       out_ref:    [Dp, TB]    f32     (transposed output block)
       counts_ref: [Vp, TB]    f32     scratch: per-batch-column vocab counts
    """
    s = pl.program_id(1)
    s_blk = idx_ref.shape[0]
    Vp, TB = counts_ref.shape

    @pl.when(s == 0)
    def _():
        counts_ref[...] = jnp.zeros_like(counts_ref)

    # Hoisted vocab iota along sublanes: row v holds vocab id v.
    vocab_iota = jax.lax.broadcasted_iota(jnp.int32, (Vp, TB), 0)

    def body(j, counts):
        tok = idx_ref[pl.ds(j, 1), :]                       # [1, TB]
        return counts + (tok == vocab_iota).astype(jnp.float32)

    # Per-position accumulate: live state is only the [Vp, TB] carry (a few
    # vregs), bounded unroll keeps the 4 VALU slots busy without blowing up
    # register pressure / code size.
    counts_ref[...] = jax.lax.fori_loop(
        0, s_blk, body, counts_ref[...], unroll=8)

    @pl.when(s == pl.num_programs(1) - 1)
    def _():
        # Embedding-bag as a tiny MXU matmul: [Dp, Vp] @ [Vp, TB] -> [Dp, TB].
        summed_t = jnp.dot(emb_t_ref[...], counts_ref[...],
                           preferred_element_type=jnp.float32)
        out_ref[...] = jnp.tanh(summed_t)


def data_encoder(idx, emb_table, *, batch_tile=128, seq_block=1024,
                 use_pallas=None):
    B, S = idx.shape
    V, D = emb_table.shape

    if use_pallas is None:
        # At tiny sizes the kernel is pure fixed overhead (padding + a single
        # grid step); plain XLA is the right call there.
        use_pallas = (B * S) >= 4096
    if not use_pallas:
        table = emb_table.astype(jnp.float32).at[0, :].set(0.0)  # padding_idx=0
        return jnp.tanh(jnp.sum(table[idx.astype(jnp.int32)], axis=1))

    # --- layout / padding ---------------------------------------------------
    tb = max(128, _round_up(int(batch_tile), 128))   # batch on the 128-lane axis
    Bp = _round_up(B, tb)
    Vp = max(32, _round_up(V, 8))                    # vocab on sublanes (23->32)
    Dp = _round_up(D, 8)                             # emb_dim on sublanes
    s_blk = min(_round_up(int(seq_block), 8), _round_up(S, 8))
    Sp = _round_up(S, s_blk)

    # padding_idx=0: row 0 contributes nothing.  This also makes the zero-padded
    # idx slots (batch / sequence padding) harmless.
    emb_f32 = emb_table.astype(jnp.float32).at[0, :].set(0.0)
    emb_t_p = jnp.zeros((Dp, Vp), jnp.float32).at[:D, :V].set(emb_f32.T)

    # NOTE: ids must lie in [0, V); out-of-range ids silently hit padded (zero)
    # vocab rows instead of erroring like nn.Embedding.
    idx_t_p = jnp.zeros((Sp, Bp), jnp.int32).at[:S, :B].set(
        idx.astype(jnp.int32).T)

    grid = (Bp // tb, Sp // s_blk)

    cost = pl.CostEstimate(
        # dominant cost is the per-token compare/accumulate over the padded
        # vocab; the embedding matmul per batch tile is negligible but counted.
        flops=2 * Bp * Sp * Vp + 2 * (Bp // tb) * Dp * Vp * tb,
        transcendentals=Bp * Dp,
        bytes_accessed=(idx_t_p.size * 4
                        + (Bp // tb) * emb_t_p.size * 4
                        + Bp * Dp * 4),
    )

    out_t = pl.pallas_call(
        data_encoder_kernel,
        out_shape=jax.ShapeDtypeStruct((Dp, Bp), jnp.float32),
        grid=grid,
        in_specs=[
            pl.BlockSpec((s_blk, tb), lambda i, s: (s, i)),   # streamed idx chunk
            pl.BlockSpec((Dp, Vp), lambda i, s: (0, 0)),      # full padded table
        ],
        out_specs=pl.BlockSpec((Dp, tb), lambda i, s: (0, i)),
        scratch_shapes=[pltpu.VMEM((Vp, tb), jnp.float32)],
        compiler_params=pltpu.CompilerParams(
            dimension_semantics=("parallel", "arbitrary")),
        cost_estimate=cost,
    )(idx_t_p, emb_t_p)

    # layout plumbing back to the PyTorch convention
    return out_t[:D, :B].T


def make_embedding_table(key, vocab, dim):
    # xavier_uniform for Embedding(vocab, dim): bound = sqrt(6/(vocab+dim))
    bound = np.sqrt(6.0 / (vocab + dim))
    w = jax.random.uniform(key, (vocab, dim), jnp.float32, -bound, bound)
    # padding_idx=0 -> row 0 is zero (wrapper also enforces this)
    w = w.at[0, :].set(0.0)
    return w


if __name__ == "__main__":
    key = jax.random.PRNGKey(0)
    k_emb, k_idx, k_idx2 = jax.random.split(key, 3)

    B, S = 2, 8
    emb_table = make_embedding_table(k_emb, VOCAB, EMB_DIM)
    idx = jax.random.randint(k_idx, (B, S), 0, VOCAB, dtype=jnp.int32)

    # Force the Pallas path even at this tiny demo size.
    out = data_encoder(idx, emb_table, use_pallas=True)
    out = jax.block_until_ready(out)
    ref = jnp.tanh(jnp.sum(emb_table[idx], axis=1))
    np.testing.assert_allclose(np.asarray(out), np.asarray(ref),
                               rtol=1e-5, atol=1e-5)

    # A larger, oddly-shaped case (exercises batch/seq/vocab padding + the
    # streamed sequence axis) through the default (auto -> Pallas) path.
    B2, S2 = 64, 200
    idx2 = jax.random.randint(k_idx2, (B2, S2), 0, VOCAB, dtype=jnp.int32)
    out2 = jax.block_until_ready(data_encoder(idx2, emb_table))
    ref2 = jnp.tanh(jnp.sum(emb_table[idx2], axis=1))
    np.testing.assert_allclose(np.asarray(out2), np.asarray(ref2),
                               rtol=1e-5, atol=1e-5)

    # Plain-XLA fallback (used automatically for tiny inputs) stays consistent.
    out_small = jax.block_until_ready(
        data_encoder(idx, emb_table, use_pallas=False))
    np.testing.assert_allclose(np.asarray(out_small), np.asarray(ref),
                               rtol=1e-5, atol=1e-5)

    print("KERNEL_OK")
</pallas_src>

<mosaic_0001>
module attributes {stable_mosaic.version = 11 : i64} {
  func.func @data_encoder_kernel(%arg0: i32, %arg1: i32, %arg2: memref<8x128xi32, #tpu.memory_space<vmem>>, %arg3: memref<32x32xf32, #tpu.memory_space<vmem>>, %arg4: memref<32x128xf32, #tpu.memory_space<vmem>>, %arg5: memref<32x128xf32, #tpu.memory_space<vmem>>) attributes {dimension_semantics = [#tpu.dimension_semantics<parallel>, #tpu.dimension_semantics<arbitrary>], iteration_bounds = array<i64: 1, 1>, scalar_prefetch = 0 : i64, scratch_operands = 1 : i64, tpu.core_type = #tpu.core_type<tc>, window_params = [{transform_indices = @transform_0, window_bounds = array<i64: 8, 128>}, {pipeline_mode = #tpu.pipeline_mode<synchronous>, transform_indices = @transform_1, window_bounds = array<i64: 32, 32>}, {transform_indices = @transform_2, window_bounds = array<i64: 32, 128>}]} {
    %c0_i32 = arith.constant 0 : i32
    %0 = arith.cmpi eq, %arg1, %c0_i32 : i32
    %1 = arith.extui %0 : i1 to i32
    %c0_i32_0 = arith.constant 0 : i32
    %2 = arith.cmpi ne, %1, %c0_i32_0 : i32
    scf.if %2 {
      %cst = arith.constant 0.000000e+00 : f32
      %65 = vector.broadcast %cst : f32 to vector<32x128xf32>
      %c0_15 = arith.constant 0 : index
      %c0_16 = arith.constant 0 : index
      %66 = vector.load %arg5[%c0_15, %c0_16] : memref<32x128xf32, #tpu.memory_space<vmem>>, vector<32x128xf32>
      tpu.vector_store %arg5[%c0_15, %c0_16], %65 {strides = array<i32>} : memref<32x128xf32, #tpu.memory_space<vmem>>, vector<32x128xf32>,
    } else {
    }
    %3 = tpu.iota {dimensions = array<i32: 0>} : vector<32x128xi32>
    %c0 = arith.constant 0 : index
    %c0_1 = arith.constant 0 : index
    %4 = vector.load %arg5[%c0, %c0_1] : memref<32x128xf32, #tpu.memory_space<vmem>>, vector<32x128xf32>
    %c0_i32_2 = arith.constant 0 : i32
    %5 = arith.index_cast %c0_i32_2 : i32 to index
    %c0_3 = arith.constant 0 : index
    %6 = vector.load %arg2[%5, %c0_3] : memref<8x128xi32, #tpu.memory_space<vmem>>, vector<1x128xi32>
    %7 = vector.broadcast %6 : vector<1x128xi32> to vector<32x128xi32>
    %8 = arith.cmpi eq, %7, %3 : vector<32x128xi32>
    %9 = arith.extui %8 : vector<32x128xi1> to vector<32x128xi32>
    %10 = arith.sitofp %9 : vector<32x128xi32> to vector<32x128xf32>
    %11 = arith.addf %4, %10 : vector<32x128xf32>
    %c1_i32 = arith.constant 1 : i32
    %12 = arith.index_cast %c1_i32 : i32 to index
    %c0_4 = arith.constant 0 : index
    %13 = vector.load %arg2[%12, %c0_4] : memref<8x128xi32, #tpu.memory_space<vmem>>, vector<1x128xi32>
    %14 = vector.broadcast %13 : vector<1x128xi32> to vector<32x128xi32>
    %15 = arith.cmpi eq, %14, %3 : vector<32x128xi32>
    %16 = arith.extui %15 : vector<32x128xi1> to vector<32x128xi32>
    %17 = arith.sitofp %16 : vector<32x128xi32> to vector<32x128xf32>
    %18 = arith.addf %11, %17 : vector<32x128xf32>
    %c2_i32 = arith.constant 2 : i32
    %19 = arith.index_cast %c2_i32 : i32 to index
    %c0_5 = arith.constant 0 : index
    %20 = vector.load %arg2[%19, %c0_5] : memref<8x128xi32, #tpu.memory_space<vmem>>, vector<1x128xi32>
    %21 = vector.broadcast %20 : vector<1x128xi32> to vector<32x128xi32>
    %22 = arith.cmpi eq, %21, %3 : vector<32x128xi32>
    %23 = arith.extui %22 : vector<32x128xi1> to vector<32x128xi32>
    %24 = arith.sitofp %23 : vector<32x128xi32> to vector<32x128xf32>
    %25 = arith.addf %18, %24 : vector<32x128xf32>
    %c3_i32 = arith.constant 3 : i32
    %26 = arith.index_cast %c3_i32 : i32 to index
    %c0_6 = arith.constant 0 : index
    %27 = vector.load %arg2[%26, %c0_6] : memref<8x128xi32, #tpu.memory_space<vmem>>, vector<1x128xi32>
    %28 = vector.broadcast %27 : vector<1x128xi32> to vector<32x128xi32>
    %29 = arith.cmpi eq, %28, %3 : vector<32x128xi32>
    %30 = arith.extui %29 : vector<32x128xi1> to vector<32x128xi32>
    %31 = arith.sitofp %30 : vector<32x128xi32> to vector<32x128xf32>
    %32 = arith.addf %25, %31 : vector<32x128xf32>
    %c4_i32 = arith.constant 4 : i32
    %33 = arith.index_cast %c4_i32 : i32 to index
    %c0_7 = arith.constant 0 : index
    %34 = vector.load %arg2[%33, %c0_7] : memref<8x128xi32, #tpu.memory_space<vmem>>, vector<1x128xi32>
    %35 = vector.broadcast %34 : vector<1x128xi32> to vector<32x128xi32>
    %36 = arith.cmpi eq, %35, %3 : vector<32x128xi32>
    %37 = arith.extui %36 : vector<32x128xi1> to vector<32x128xi32>
    %38 = arith.sitofp %37 : vector<32x128xi32> to vector<32x128xf32>
    %39 = arith.addf %32, %38 : vector<32x128xf32>
    %c5_i32 = arith.constant 5 : i32
    %40 = arith.index_cast %c5_i32 : i32 to index
    %c0_8 = arith.constant 0 : index
    %41 = vector.load %arg2[%40, %c0_8] : memref<8x128xi32, #tpu.memory_space<vmem>>, vector<1x128xi32>
    %42 = vector.broadcast %41 : vector<1x128xi32> to vector<32x128xi32>
    %43 = arith.cmpi eq, %42, %3 : vector<32x128xi32>
    %44 = arith.extui %43 : vector<32x128xi1> to vector<32x128xi32>
    %45 = arith.sitofp %44 : vector<32x128xi32> to vector<32x128xf32>
    %46 = arith.addf %39, %45 : vector<32x128xf32>
    %c6_i32 = arith.constant 6 : i32
    %47 = arith.index_cast %c6_i32 : i32 to index
    %c0_9 = arith.constant 0 : index
    %48 = vector.load %arg2[%47, %c0_9] : memref<8x128xi32, #tpu.memory_space<vmem>>, vector<1x128xi32>
    %49 = vector.broadcast %48 : vector<1x128xi32> to vector<32x128xi32>
    %50 = arith.cmpi eq, %49, %3 : vector<32x128xi32>
    %51 = arith.extui %50 : vector<32x128xi1> to vector<32x128xi32>
    %52 = arith.sitofp %51 : vector<32x128xi32> to vector<32x128xf32>
    %53 = arith.addf %46, %52 : vector<32x128xf32>
    %c7_i32 = arith.constant 7 : i32
    %54 = arith.index_cast %c7_i32 : i32 to index
    %c0_10 = arith.constant 0 : index
    %55 = vector.load %arg2[%54, %c0_10] : memref<8x128xi32, #tpu.memory_space<vmem>>, vector<1x128xi32>
    %56 = vector.broadcast %55 : vector<1x128xi32> to vector<32x128xi32>
    %57 = arith.cmpi eq, %56, %3 : vector<32x128xi32>
    %58 = arith.extui %57 : vector<32x128xi1> to vector<32x128xi32>
    %59 = arith.sitofp %58 : vector<32x128xi32> to vector<32x128xf32>
    %60 = arith.addf %53, %59 : vector<32x128xf32>
    %c8_i32 = arith.constant 8 : i32
    %c0_11 = arith.constant 0 : index
    %c0_12 = arith.constant 0 : index
    %61 = vector.load %arg5[%c0_11, %c0_12] : memref<32x128xf32, #tpu.memory_space<vmem>>, vector<32x128xf32>
    tpu.vector_store %arg5[%c0_11, %c0_12], %60 {strides = array<i32>} : memref<32x128xf32, #tpu.memory_space<vmem>>, vector<32x128xf32>,
    %c0_i32_13 = arith.constant 0 : i32
    %62 = arith.cmpi eq, %arg1, %c0_i32_13 : i32
    %63 = arith.extui %62 : i1 to i32
    %c0_i32_14 = arith.constant 0 : i32
    %64 = arith.cmpi ne, %63, %c0_i32_14 : i32
    scf.if %64 {
      %c0_15 = arith.constant 0 : index
      %c0_16 = arith.constant 0 : index
      %65 = vector.load %arg3[%c0_15, %c0_16] : memref<32x32xf32, #tpu.memory_space<vmem>>, vector<32x32xf32>
      %c0_17 = arith.constant 0 : index
      %c0_18 = arith.constant 0 : index
      %66 = vector.load %arg5[%c0_17, %c0_18] : memref<32x128xf32, #tpu.memory_space<vmem>>, vector<32x128xf32>
      %cst = arith.constant dense<0.000000e+00> : vector<32x128xf32>
      %67 = tpu.matmul %65, %66, %cst {dimension_numbers = #tpu.dot_dimension_numbers<[1], [0], [0], [1], [0, 0, 1, 1], [], []>} : vector<32x32xf32>, vector<32x128xf32>, vector<32x128xf32> -> vector<32x128xf32>
      %68 = math.tanh %67 : vector<32x128xf32>
      %c0_19 = arith.constant 0 : index
      %c0_20 = arith.constant 0 : index
      %69 = vector.load %arg4[%c0_19, %c0_20] : memref<32x128xf32, #tpu.memory_space<vmem>>, vector<32x128xf32>
      tpu.vector_store %arg4[%c0_19, %c0_20], %68 {strides = array<i32>} : memref<32x128xf32, #tpu.memory_space<vmem>>, vector<32x128xf32>,
    } else {
    }
    return
  }
  func.func @transform_0(%arg0: i32, %arg1: i32) -> (i32, i32) {
    %c0_i32 = arith.constant 0 : i32
    return %arg1, %arg0 : i32, i32
  }
  func.func @transform_1(%arg0: i32, %arg1: i32) -> (i32, i32) {
    %c0_i32 = arith.constant 0 : i32
    %c0_i32_0 = arith.constant 0 : i32
    %c0_i32_1 = arith.constant 0 : i32
    return %c0_i32, %c0_i32_0 : i32, i32
  }
  func.func @transform_2(%arg0: i32, %arg1: i32) -> (i32, i32) {
    %c0_i32 = arith.constant 0 : i32
    %c0_i32_0 = arith.constant 0 : i32
    return %c0_i32, %arg0 : i32, i32
  }
}

</mosaic_0001>

<bundles_post_ra>
// kernel: tpu_custom_call.1
= control target key start
LH: loop header
LB: loop body
LE: loop exit
PB: predicated region body
PF: predicated region fallthrough
CT: control target
= control target key end

     0   :  { %7 = vsyncpa [#allocation4], 0  ;;  %s694_s0 = inlined_call_operand.hbm [shape: s32[8,128], index: 0, kind: input, shape index: {}]   ;;  %s695_s1 = inlined_call_operand.hbm [shape: f32[32,32], index: 1, kind: input, shape index: {}]   ;;  %s696_s2 = inlined_call_operand.hbm [shape: f32[32,128], index: 2, kind: output, shape index: {}]  }
   0x1   :  { %8 = vsyncpa [#allocation7], 0 }
   0x2   :  { %9 = vsyncpa [#allocation5], 0  ;;  %s526_s9 = smov [#allocation3]   ;;  %s527_s11 = smov [#allocation6]  }
   0x3   :  { %s16_s10 = sshll.u32 %s526_s9, 4  ;;  %s25_s12 = sshll.u32 %s527_s11, 4  ;;  %s17_s10 = int_to_ptr.vmem [resolvable:$true] %s16_s10  ;;  %s547_s12 = int_to_ptr.vmem [resolvable:$true] %s25_s12 }
   0x4   :  { %s454_s15 = scalar_lea.hbm %s694_s0, 128 }
   0x5   :  { %p455_p0 = scmp.ne.s32.totalorder %s694_s0, %s454_s15  ;;  %p458_p1 = scmp.lt.u32.totalorder %s454_s15, %s694_s0 }
   0x7   :  { %p460_p2 = pnand %p458_p1, %p455_p0 }
   0x9   :  { %463 = shalt.err (!%p460_p2)
}
   0xa   :  { %s464_s20 = scalar_lea.vmem %s17_s10, 128  ;;  %p469_p4 = scmp.lt.s32.totalorder %s17_s10, %s17_s10 }
   0xb   :  { %p465_p3 = scmp.ne.s32.totalorder %s17_s10, %s464_s20  ;;  %p470_p5 = scmp.lt.s32.totalorder %s464_s20, %s464_s20 }
   0xd   :  { %p471_p6 = por %p470_p5, %p469_p4 }
   0xf   :  { %p472_p7 = pnand %p471_p6, %p465_p3 }
  0x11   :  { %475 = shalt.err (!%p472_p7)
}
  0x12   :  { %19 = dma.hbm_to_vmem [thread:$0]  %s694_s0, 128, %s17_s10, [#allocation4]  }
  0x13   :  { %s476_s25 = scalar_lea.hbm %s695_s1, 512 }
  0x14   :  { %p477_p8 = scmp.ne.s32.totalorder %s695_s1, %s476_s25  ;;  %p480_p9 = scmp.lt.u32.totalorder %s476_s25, %s695_s1 }
  0x16   :  { %p482_p10 = pnand %p480_p9, %p477_p8 }
  0x18   :  { %485 = shalt.err (!%p482_p10)
}
  0x19   :  { %s486_s30 = scalar_lea.vmem %s547_s12, 512  ;;  %p491_p12 = scmp.lt.s32.totalorder %s547_s12, %s547_s12 }
  0x1a   :  { %p487_p11 = scmp.ne.s32.totalorder %s547_s12, %s486_s30  ;;  %p492_p13 = scmp.lt.s32.totalorder %s486_s30, %s486_s30 }
  0x1c   :  { %p493_p0 = por %p492_p13, %p491_p12 }
  0x1e   :  { %p494_p1 = pnand %p493_p0, %p487_p11 }
  0x20   :  { %497 = shalt.err (!%p494_p1)
}
  0x21   :  { %s528_s0 = smov 128   ;;  %s529_s3 = smov 8  }
  0x22   :  { %31 = dma.hbm_to_vmem [thread:$0]  %s695_s1, 512, %s547_s12, [#allocation7], %s528_s0, %s528_s0, %s529_s3  }
  0x23   :  { %520 = dma.done.wait [#allocation4], 128  }
  0x24   :  { %521 = vsyncadd [#allocation4], 4294967168 }
  0x25   :  { %522 = dma.done.wait [#allocation7], 512  }
  0x26   :  { %523 = vsyncadd [#allocation7], 4294966784  ;;  %v46_v0 = vlaneseq  ;;  %vm238_vm0 = vcmask 261120   ;;  %v362_v5 = vld [vmem:[#allocation3] ss:$0 sm:$0xff]  ;;  %v530_v9 = vmov 0.0  }
  0x27   :  { %v585_v6 = vld [vmem:[#allocation3 + $0x1] ss:$0 sm:$0xff]  ;;  %v587_v7 = vld [vmem:[#allocation3 + $0x2] ss:$0 sm:$0xff]  ;;  %v591_v8 = vld [vmem:[#allocation3 + $0x3] ss:$0 sm:$0xff] }
  0x28   :  { %v47_v1 = vshrl.u32 %v46_v0, 7  ;;  %v597_v14 = vld [vmem:[#allocation3 + $0x4] ss:$0 sm:$0xff]  ;;  %v601_v17 = vld [vmem:[#allocation3 + $0x5] ss:$0 sm:$0xff]  ;;  %v230_v18 = vld [vmem:[#allocation6] sm:$0xff] }
  0x29   :  { %v232_v19 = vld [vmem:[#allocation6 + $0x10] sm:$0xff]  ;;  %422 = vmatprep.mubr.msk.f32.mxu0 %vm238_vm0, %v230_v18  ;;  %v611_v26 = vld [vmem:[#allocation3 + $0x6] ss:$0 sm:$0xff]  ;;  %v619_v31 = vld [vmem:[#allocation3 + $0x7] ss:$0 sm:$0xff]  ;;  %s531_s1 = smov [#allocation8]  }
  0x2a   :  { %v48_v2 = vadd.s32 8, %v47_v1  ;;  %v581_v3 = vadd.s32 16, %v47_v1  ;;  %v583_v4 = vadd.s32 24, %v47_v1  ;;  %vm60_vm1 = vcmp.eq.s32.totalorder %v362_v5, %v47_v1  ;;  %425 = vmatprep.mubr.msk.f32.mxu1 %vm238_vm0, %v232_v19  ;;  %s349_s6 = sshll.u32 %s531_s1, 4  ;;  %s350_s6 = int_to_ptr.vmem [resolvable:$true] %s349_s6 }
  0x2b   :  { %vm81_vm3 = vcmp.eq.s32.totalorder %v585_v6, %v47_v1  ;;  %v363_v10 = vsel %vm60_vm1, 1.0, %v530_v9  ;;  %vm102_vm5 = vcmp.eq.s32.totalorder %v587_v7, %v47_v1  ;;  %vm123_vm7 = vcmp.eq.s32.totalorder %v591_v8, %v47_v1  ;;  %s498_s7 = scalar_lea.vmem %s350_s6, 512  ;;  %p503_p3 = scmp.lt.s32.totalorder %s350_s6, %s350_s6 }
  0x2c   :  { %vm61_vm2 = vcmp.eq.s32.totalorder %v362_v5, %v48_v2  ;;  %vm82_vm4 = vcmp.eq.s32.totalorder %v585_v6, %v48_v2  ;;  %v368_v12 = vsel %vm81_vm3, 1.0, %v530_v9  ;;  %vm103_vm6 = vcmp.eq.s32.totalorder %v587_v7, %v48_v2  ;;  %p499_p2 = scmp.ne.s32.totalorder %s350_s6, %s498_s7  ;;  %p504_p4 = scmp.lt.s32.totalorder %s498_s7, %s498_s7 }
  0x2d   :  { %v364_v11 = vsel %vm61_vm2, 1.0, %v530_v9  ;;  %v369_v13 = vsel %vm82_vm4, 1.0, %v530_v9  ;;  %v93_v15 = vadd.f32 %v368_v12, %v363_v10  ;;  %v373_v20 = vsel %vm102_vm5, 1.0, %v530_v9 }
  0x2e   :  { %v94_v16 = vadd.f32 %v369_v13, %v364_v11  ;;  %v374_v21 = vsel %vm103_vm6, 1.0, %v530_v9  ;;  %vm124_vm8 = vcmp.eq.s32.totalorder %v591_v8, %v48_v2  ;;  %v378_v24 = vsel %vm123_vm7, 1.0, %v530_v9  ;;  %p505_p5 = por %p504_p4, %p503_p3 }
  0x2f   :  { %v114_v22 = vadd.f32 %v373_v20, %v93_v15  ;;  %v379_v25 = vsel %vm124_vm8, 1.0, %v530_v9  ;;  %vm144_vm9 = vcmp.eq.s32.totalorder %v597_v14, %v47_v1  ;;  %vm145_vm10 = vcmp.eq.s32.totalorder %v597_v14, %v48_v2 }
  0x30   :  { %v115_v23 = vadd.f32 %v374_v21, %v94_v16  ;;  %vm165_vm11 = vcmp.eq.s32.totalorder %v601_v17, %v47_v1  ;;  %vm166_vm12 = vcmp.eq.s32.totalorder %v601_v17, %v48_v2  ;;  %v383_v29 = vsel %vm144_vm9, 1.0, %v530_v9  ;;  %p506_p6 = pnand %p505_p5, %p499_p2 }
  0x31   :  { %v135_v27 = vadd.f32 %v378_v24, %v114_v22  ;;  %v384_v30 = vsel %vm145_vm10, 1.0, %v530_v9  ;;  %v388_v32 = vsel %vm165_vm11, 1.0, %v530_v9  ;;  %v389_v33 = vsel %vm166_vm12, 1.0, %v530_v9 }
  0x32   :  { %v136_v28 = vadd.f32 %v379_v25, %v115_v23  ;;  %vm186_vm13 = vcmp.eq.s32.totalorder %v611_v26, %v47_v1  ;;  %vm187_vm14 = vcmp.eq.s32.totalorder %v611_v26, %v48_v2  ;;  %vm207_vm15 = vcmp.eq.s32.totalorder %v619_v31, %v47_v1 }
  0x33   :  { %v156_v34 = vadd.f32 %v383_v29, %v135_v27  ;;  %v393_v36 = vsel %vm186_vm13, 1.0, %v530_v9  ;;  %v394_v37 = vsel %vm187_vm14, 1.0, %v530_v9  ;;  %vm208_vm1 = vcmp.eq.s32.totalorder %v619_v31, %v48_v2 }
  0x34   :  { %v157_v35 = vadd.f32 %v384_v30, %v136_v28  ;;  %vm62_vm2 = vcmp.eq.s32.totalorder %v362_v5, %v581_v3  ;;  %vm63_vm3 = vcmp.eq.s32.totalorder %v362_v5, %v583_v4  ;;  %v398_v40 = vsel %vm207_vm15, 1.0, %v530_v9 }
  0x35   :  { %v177_v38 = vadd.f32 %v388_v32, %v156_v34  ;;  %v399_v41 = vsel %vm208_vm1, 1.0, %v530_v9  ;;  %v365_v42 = vsel %vm62_vm2, 1.0, %v530_v9  ;;  %v366_v43 = vsel %vm63_vm3, 1.0, %v530_v9 }
  0x36   :  { %v178_v39 = vadd.f32 %v389_v33, %v157_v35  ;;  %vm83_vm4 = vcmp.eq.s32.totalorder %v585_v6, %v581_v3  ;;  %vm84_vm5 = vcmp.eq.s32.totalorder %v585_v6, %v583_v4  ;;  %vm104_vm6 = vcmp.eq.s32.totalorder %v587_v7, %v581_v3 }
  0x37   :  { %v198_v44 = vadd.f32 %v393_v36, %v177_v38  ;;  %v370_v46 = vsel %vm83_vm4, 1.0, %v530_v9  ;;  %v371_v47 = vsel %vm84_vm5, 1.0, %v530_v9  ;;  %vm105_vm7 = vcmp.eq.s32.totalorder %v587_v7, %v583_v4 }
  0x38   :  { %v199_v45 = vadd.f32 %v394_v37, %v178_v39  ;;  %v95_v48 = vadd.f32 %v370_v46, %v365_v42  ;;  %v96_v49 = vadd.f32 %v371_v47, %v366_v43  ;;  %v375_v52 = vsel %vm104_vm6, 1.0, %v530_v9 }
  0x39   :  { %v219_v50 = vadd.f32 %v398_v40, %v198_v44  ;;  %v376_v53 = vsel %vm105_vm7, 1.0, %v530_v9  ;;  %vm125_vm8 = vcmp.eq.s32.totalorder %v591_v8, %v581_v3  ;;  %vm126_vm9 = vcmp.eq.s32.totalorder %v591_v8, %v583_v4 }
  0x3a   :  { %v220_v51 = vadd.f32 %v399_v41, %v199_v45  ;;  %v116_v54 = vadd.f32 %v375_v52, %v95_v48  ;;  %v117_v55 = vadd.f32 %v376_v53, %v96_v49  ;;  %v380_v57 = vsel %vm125_vm8, 1.0, %v530_v9 }
  0x3b   :  { %v381_v58 = vsel %vm126_vm9, 1.0, %v530_v9  ;;  %vm146_vm10 = vcmp.eq.s32.totalorder %v597_v14, %v581_v3  ;;  %vm147_vm11 = vcmp.eq.s32.totalorder %v597_v14, %v583_v4  ;;  %vm167_vm12 = vcmp.eq.s32.totalorder %v601_v17, %v581_v3 }
  0x3c   :  { %v428_v56 = vpack.c.bf16 %v220_v51, %v219_v50  ;;  %v137_v59 = vadd.f32 %v380_v57, %v116_v54  ;;  %v138_v60 = vadd.f32 %v381_v58, %v117_v55  ;;  %v385_v61 = vsel %vm146_vm10, 1.0, %v530_v9 }
  0x3d   :  { %v386_v62 = vsel %vm147_vm11, 1.0, %v530_v9  ;;  %vm168_vm13 = vcmp.eq.s32.totalorder %v601_v17, %v583_v4  ;;  %vm188_vm14 = vcmp.eq.s32.totalorder %v611_v26, %v581_v3  ;;  %v390_v1 = vsel %vm167_vm12, 1.0, %v530_v9  ;;  %v233_v17 = vld [vmem:[#allocation6 + $0x18] sm:$0xff] }
  0x3e   :  { %429 = vmatprep.subr.bf16.mxu0 %v428_v56  ;;  %436 = vmatprep.subr.bf16.mxu1 %v428_v56  ;;  %v158_v63 = vadd.f32 %v385_v61, %v137_v59  ;;  %v159_v0 = vadd.f32 %v386_v62, %v138_v60  ;;  %v391_v2 = vsel %vm168_vm13, 1.0, %v530_v9  ;;  %vm189_vm15 = vcmp.eq.s32.totalorder %v611_v26, %v583_v4 }
  0x3f   :  { %431 = vmatpush3.bf16.msra.mxu0 %v428_v56  ;;  %438 = vmatpush3.bf16.msra.mxu1 %v428_v56  ;;  %v395_v5 = vsel %vm188_vm14, 1.0, %v530_v9  ;;  %vm209_vm1 = vcmp.eq.s32.totalorder %v619_v31, %v581_v3  ;;  %vm210_vm2 = vcmp.eq.s32.totalorder %v619_v31, %v583_v4  ;;  %v396_v8 = vsel %vm189_vm15, 1.0, %v530_v9  ;;  %v231_v3 = vld [vmem:[#allocation6 + $0x8] sm:$0xff] }
  0x40   :  { %v179_v6 = vadd.f32 %v390_v1, %v158_v63  ;;  %v180_v7 = vadd.f32 %v391_v2, %v159_v0  ;;  %v400_v10 = vsel %vm209_vm1, 1.0, %v530_v9  ;;  %v401_v11 = vsel %vm210_vm2, 1.0, %v530_v9 }
  0x42   :  { %v200_v12 = vadd.f32 %v395_v5, %v179_v6  ;;  %v201_v13 = vadd.f32 %v396_v8, %v180_v7 }
  0x44   :  { %v221_v14 = vadd.f32 %v400_v10, %v200_v12  ;;  %v222_v15 = vadd.f32 %v401_v11, %v201_v13 }
  0x46   :  { %v432_v16 = vpack.c.bf16 %v222_v15, %v221_v14 }
  0x48   :  { %433 = vmatprep.subr.bf16.mxu0 %v432_v16  ;;  %437 = vmatprep.subr.bf16.mxu1 %v432_v16 }
  0x49   :  { %435 = vmatpush3.bf16.msra.mxu0 %v432_v16  ;;  %439 = vmatpush3.bf16.msra.mxu1 %v432_v16 }
  0x4c   :  { %423 = vmatmul.mubr.msk.f32.vlgmr.msra.gmra.mrb[0].mxu0 %vm238_vm0, %v231_v3  ;;  %426 = vmatmul.mubr.msk.f32.vlgmr.msra.gmra.mrb[0].mxu1 %vm238_vm0, %v233_v17 }
 0x11f   :  { %v424_v4 = vpop.f32.mrb[0].mxu0  ;;  %v427_v18 = vpop.f32.mrb[0].mxu1 }
 0x120   :  { %446 = vtanh.f32 %v424_v4  ;;  %v317_v19 = vpop.f32.mrb[1].mxu0  ;;  %v327_v9 = vpop.f32.mrb[1].mxu1 }
 0x121   :  { %448 = vtanh.f32 %v427_v18 }
 0x122   :  { %450 = vtanh.f32 %v317_v19 }
 0x123   :  { %452 = vtanh.f32 %v327_v9 }
 0x12a   :  { %v447_v20 = vpop.eup %446 }
 0x12b   :  { %v449_v21 = vpop.eup %448  ;;  %341 = vst [vmem:[#allocation8 + $0x8] sm:$0xff] %v447_v20 }
 0x12c   :  { %v451_v22 = vpop.eup %450  ;;  %343 = vst [vmem:[#allocation8 + $0x18] sm:$0xff] %v449_v21 }
 0x12d   :  { %v453_v23 = vpop.eup %452  ;;  %340 = vst [vmem:[#allocation8] sm:$0xff] %v451_v22 }
 0x12e   :  { %342 = vst [vmem:[#allocation8 + $0x10] sm:$0xff] %v453_v23 }
 0x12f   :  { %509 = shalt.err (!%p506_p6)
}
 0x130   :  { %s510_s10 = scalar_lea.hbm %s696_s2, 512 }
 0x131   :  { %p511_p7 = scmp.ne.s32.totalorder %s696_s2, %s510_s10  ;;  %p514_p8 = scmp.lt.u32.totalorder %s510_s10, %s696_s2 }
 0x133   :  { %p516_p9 = pnand %p514_p8, %p511_p7 }
 0x135   :  { %519 = shalt.err (!%p516_p9)
}
 0x136   :  { %355 = dma.vmem_to_hbm [thread:$0]  %s350_s6, 512, %s696_s2, [#allocation5], %s528_s0, %s528_s0, %s529_s3  }
 0x137   :  { %524 = dma.done.wait [#allocation5], 512  }
 0x138   :  { %525 = vsyncadd [#allocation5], 4294966784 }
 0x139   :  { %359 = vsyncpa [#allocation4], 1 }
 0x13a   :  { %360 = vsyncpa [#allocation7], 1 }
 0x13b   :  { %361 = vsyncpa [#allocation5], 1 }

</bundles_post_ra>
